<compile_context>
chip_gen: v6e
topology: v6e:2x2x1
jax: 0.10.0
libtpu: 0.0.40
codegen_flags: <defaults>
</compile_context>

<pallas_src>
import jax
import jax.numpy as jnp
from jax.experimental import pallas as pl
from jax.experimental.pallas import tpu as pltpu


# --------------------------------------------------------------------------
# Pass 1: per-token asymmetric dynamic quantization (torchao semantics).
# Emits centered integer activations (q - zp) as bf16 (exact for |v| <= 255),
# the per-token scale, and the per-token rowsum of (q - zp).
# --------------------------------------------------------------------------
def _per_token_quant_kernel(x_ref, xq_ref, scale_ref, rsum_ref):
    qmin = -128.0
    qmax = 127.0

    x = x_ref[...]  # (tm, K) f32

    min_val = jnp.min(x, axis=-1, keepdims=True)
    max_val = jnp.max(x, axis=-1, keepdims=True)
    min_neg = jnp.minimum(min_val, 0.0)
    max_pos = jnp.maximum(max_val, 0.0)
    eps = jnp.finfo(jnp.float32).eps
    scale = jnp.maximum((max_pos - min_neg) / (qmax - qmin), eps)

    descaled_min = min_neg / scale
    descaled_max = max_pos / scale
    zp_from_min_err = qmin + descaled_min
    zp_from_max_err = qmax + descaled_max
    zp = jnp.where(zp_from_min_err + zp_from_max_err > 0.0,
                   qmin - descaled_min,
                   qmax - descaled_max)
    zp = jnp.round(jnp.clip(zp, qmin, qmax))

    q = jnp.clip(jnp.round(x / scale + zp), qmin, qmax)
    centered = q - zp                                  # integer-valued, |v|<=255

    xq_ref[...] = centered.astype(jnp.bfloat16)        # exact cast
    scale_ref[...] = scale
    rsum_ref[...] = jnp.sum(centered, axis=-1, keepdims=True)


# --------------------------------------------------------------------------
# Pass 2: tiled matmul on the MXU with scale / zero-point epilogue.
#   grid = (M/tm, N/tn, K/tk), f32 accumulator in VMEM scratch.
# --------------------------------------------------------------------------
def _int8w_matmul_kernel(xq_ref, w_ref, s_ref, z_ref, xscale_ref, xrsum_ref,
                         o_ref, acc_ref):
    @pl.when(pl.program_id(2) == 0)
    def _():
        acc_ref[...] = jnp.zeros_like(acc_ref)

    xq = xq_ref[...]                           # (tm, tk) bf16 (integer values)
    w = w_ref[...].astype(jnp.bfloat16)        # (tn, tk) int8 -> bf16 (exact)

    # Contract on K of both operands (weight consumed in its (N, K) layout,
    # no explicit transpose).
    acc_ref[...] += jax.lax.dot_general(
        xq, w,
        dimension_numbers=(((1,), (1,)), ((), ())),
        preferred_element_type=jnp.float32)

    @pl.when(pl.program_id(2) == pl.num_programs(2) - 1)
    def _():
        s = s_ref[...]          # (1, tn)  per-channel weight scale
        z = z_ref[...]          # (1, tn)  per-channel weight zero point
        xs = xscale_ref[...]    # (tm, 1)  per-token activation scale
        rs = xrsum_ref[...]     # (tm, 1)  per-token sum_k (q - zp)
        acc = acc_ref[...]
        o_ref[...] = ((acc - rs * z) * (xs * s)).astype(o_ref.dtype)


def _round_up(a, b):
    return (a + b - 1) // b * b


def int8_dynact_int8_weight_linear(x, weight_int8, scales, zeros,
                                   *, tm=256, tn=256, tk=512):
    """x: (..., K) float; weight_int8: (N, K) int8; scales/zeros: (N,) f32."""
    orig_shape = x.shape
    K = orig_shape[-1]
    N = weight_int8.shape[0]

    x2d = x.astype(jnp.float32).reshape(-1, K)
    M = x2d.shape[0]

    # Tile sizes adapted to (possibly small) problem sizes; pad instead of
    # asserting divisibility.
    tm_eff = min(tm, _round_up(M, 16))     # 16 keeps bf16 sublane packing happy
    tn_eff = min(tn, _round_up(N, 128))    # lane-dense output, int8 sublanes
    tk_eff = min(tk, _round_up(K, 128))
    Mp = _round_up(M, tm_eff)
    Np = _round_up(N, tn_eff)
    Kp = _round_up(K, tk_eff)

    if Mp != M:
        x2d = jnp.pad(x2d, ((0, Mp - M), (0, 0)))

    # ---------------- pass 1: per-token dynamic quant ----------------
    xq, xscale, xrsum = pl.pallas_call(
        _per_token_quant_kernel,
        out_shape=(
            jax.ShapeDtypeStruct((Mp, K), jnp.bfloat16),
            jax.ShapeDtypeStruct((Mp, 1), jnp.float32),
            jax.ShapeDtypeStruct((Mp, 1), jnp.float32),
        ),
        grid_spec=pltpu.PrefetchScalarGridSpec(
            num_scalar_prefetch=0,
            grid=(Mp // tm_eff,),
            in_specs=[pl.BlockSpec((tm_eff, K), lambda i: (i, 0))],
            out_specs=(
                pl.BlockSpec((tm_eff, K), lambda i: (i, 0)),
                pl.BlockSpec((tm_eff, 1), lambda i: (i, 0)),
                pl.BlockSpec((tm_eff, 1), lambda i: (i, 0)),
            ),
        ),
        compiler_params=pltpu.CompilerParams(
            dimension_semantics=("parallel",)),
    )(x2d)

    # ---------------- pad operands to tile multiples ----------------
    wq = weight_int8
    s2d = scales.astype(jnp.float32).reshape(1, N)
    z2d = zeros.astype(jnp.float32).reshape(1, N)
    if Kp != K:
        xq = jnp.pad(xq, ((0, 0), (0, Kp - K)))
        wq = jnp.pad(wq, ((0, 0), (0, Kp - K)))
    if Np != N:
        wq = jnp.pad(wq, ((0, Np - N), (0, 0)))
        s2d = jnp.pad(s2d, ((0, 0), (0, Np - N)))
        z2d = jnp.pad(z2d, ((0, 0), (0, Np - N)))

    # Conservative scoped-VMEM sizing (double-buffered inputs/outputs + acc),
    # floored at 16 MiB so it never undercuts real usage, capped for v7x.
    vmem_bytes = (2 * (tm_eff * tk_eff * 2        # xq tile (bf16)
                       + tn_eff * tk_eff * 1      # weight tile (int8)
                       + 2 * tn_eff * 4           # scales + zeros
                       + 2 * tm_eff * 4           # xscale + xrsum
                       + tm_eff * tn_eff * 4)     # output tile
                  + tm_eff * tn_eff * 4)          # accumulator scratch
    vmem_limit = int(min(max(4 * vmem_bytes, 16 << 20), 64 << 20))

    grid = (Mp // tm_eff, Np // tn_eff, Kp // tk_eff)

    out = pl.pallas_call(
        _int8w_matmul_kernel,
        out_shape=jax.ShapeDtypeStruct((Mp, Np), jnp.float32),
        grid_spec=pltpu.PrefetchScalarGridSpec(
            num_scalar_prefetch=0,
            grid=grid,
            in_specs=[
                pl.BlockSpec((tm_eff, tk_eff), lambda i, j, k: (i, k)),  # xq
                pl.BlockSpec((tn_eff, tk_eff), lambda i, j, k: (j, k)),  # w int8
                pl.BlockSpec((1, tn_eff), lambda i, j, k: (0, j)),       # scales
                pl.BlockSpec((1, tn_eff), lambda i, j, k: (0, j)),       # zeros
                pl.BlockSpec((tm_eff, 1), lambda i, j, k: (i, 0)),       # x scale
                pl.BlockSpec((tm_eff, 1), lambda i, j, k: (i, 0)),       # x rowsum
            ],
            out_specs=pl.BlockSpec((tm_eff, tn_eff), lambda i, j, k: (i, j)),
            scratch_shapes=[pltpu.VMEM((tm_eff, tn_eff), jnp.float32)],
        ),
        compiler_params=pltpu.CompilerParams(
            dimension_semantics=("parallel", "parallel", "arbitrary"),
            vmem_limit_bytes=vmem_limit),
        cost_estimate=pl.CostEstimate(
            flops=2 * Mp * Np * Kp,
            transcendentals=0,
            bytes_accessed=Mp * Kp * 2 + Np * Kp + Mp * Np * 4),
    )(xq, wq, s2d, z2d, xscale, xrsum)

    out = out[:M, :N]
    return out.reshape(*orig_shape[:-1], N)


# --------------------------------------------------------------------------
# Pure-JAX reference of the original (dequantize-then-matmul) formulation.
# --------------------------------------------------------------------------
def _reference(x, weight_int8, scales, zeros):
    qmin, qmax = -128.0, 127.0
    x = x.astype(jnp.float32)
    min_val = jnp.min(x, axis=-1, keepdims=True)
    max_val = jnp.max(x, axis=-1, keepdims=True)
    min_neg = jnp.minimum(min_val, 0.0)
    max_pos = jnp.maximum(max_val, 0.0)
    scale = jnp.maximum((max_pos - min_neg) / (qmax - qmin),
                        jnp.finfo(jnp.float32).eps)
    dmin = min_neg / scale
    dmax = max_pos / scale
    zp = jnp.where((qmin + dmin) + (qmax + dmax) > 0.0, qmin - dmin, qmax - dmax)
    zp = jnp.round(jnp.clip(zp, qmin, qmax))
    q = jnp.clip(jnp.round(x / scale + zp), qmin, qmax)
    x_fq = (q - zp) * scale
    w_dq = (weight_int8.astype(jnp.float32) - zeros[:, None]) * scales[:, None]
    return jnp.einsum("...k,nk->...n", x_fq, w_dq,
                      precision=jax.lax.Precision.HIGHEST)


if __name__ == "__main__":
    key = jax.random.PRNGKey(0)
    k1, k2, k3, k4 = jax.random.split(key, 4)

    batch, seq, in_features, out_features = 2, 8, 512, 384

    x = jax.random.normal(k1, (batch, seq, in_features), dtype=jnp.float32)
    weight_int8 = jax.random.randint(
        k2, (out_features, in_features), -128, 128, dtype=jnp.int32
    ).astype(jnp.int8)
    scales = jax.random.uniform(
        k3, (out_features,), minval=0.005, maxval=0.02, dtype=jnp.float32)
    zeros = jnp.round(
        jax.random.uniform(k4, (out_features,), minval=-4.0, maxval=4.0)
    ).astype(jnp.float32)

    # tk=256 forces a multi-step K reduction; N=384 exercises N-tiling + padding.
    out = int8_dynact_int8_weight_linear(x, weight_int8, scales, zeros, tk=256)
    out = jax.block_until_ready(out)

    ref = _reference(x, weight_int8, scales, zeros)
    assert out.shape == (batch, seq, out_features)
    assert jnp.allclose(out, ref, rtol=1e-3, atol=1e-3), "mismatch vs reference"

    print("KERNEL_OK")
</pallas_src>

<mosaic_0001>
module attributes {stable_mosaic.version = 11 : i64} {
  func.func @_per_token_quant_kernel(%arg0: i32, %arg1: memref<16x512xf32, #tpu.memory_space<vmem>>, %arg2: memref<16x512xbf16, #tpu.memory_space<vmem>>, %arg3: memref<16x1xf32, #tpu.memory_space<vmem>>, %arg4: memref<16x1xf32, #tpu.memory_space<vmem>>) attributes {dimension_semantics = [#tpu.dimension_semantics<parallel>], iteration_bounds = array<i64: 1>, scalar_prefetch = 0 : i64, scratch_operands = 0 : i64, tpu.core_type = #tpu.core_type<tc>, window_params = [{transform_indices = @transform_0, window_bounds = array<i64: 16, 512>}, {transform_indices = @transform_1, window_bounds = array<i64: 16, 512>}, {transform_indices = @transform_2, window_bounds = array<i64: 16, 1>}, {transform_indices = @transform_3, window_bounds = array<i64: 16, 1>}]} {
    %c0 = arith.constant 0 : index
    %c0_0 = arith.constant 0 : index
    %0 = vector.load %arg1[%c0, %c0_0] : memref<16x512xf32, #tpu.memory_space<vmem>>, vector<16x512xf32>
    %cst = arith.constant dense<0x7F800000> : vector<16xf32>
    %1 = vector.multi_reduction <minimumf>, %0, %cst [1] : vector<16x512xf32> to vector<16xf32>
    %2 = vector.shape_cast %1 : vector<16xf32> to vector<16x1xf32>
    %cst_1 = arith.constant dense<0xFF800000> : vector<16xf32>
    %3 = vector.multi_reduction <maximumf>, %0, %cst_1 [1] : vector<16x512xf32> to vector<16xf32>
    %4 = vector.shape_cast %3 : vector<16xf32> to vector<16x1xf32>
    %cst_2 = arith.constant 0.000000e+00 : f32
    %5 = vector.broadcast %cst_2 : f32 to vector<16x1xf32>
    %6 = arith.minimumf %2, %5 : vector<16x1xf32>
    %cst_3 = arith.constant 0.000000e+00 : f32
    %7 = vector.broadcast %cst_3 : f32 to vector<16x1xf32>
    %8 = arith.maximumf %4, %7 : vector<16x1xf32>
    %9 = arith.subf %8, %6 : vector<16x1xf32>
    %cst_4 = arith.constant 2.550000e+02 : f32
    %10 = vector.broadcast %cst_4 : f32 to vector<16x1xf32>
    %11 = arith.divf %9, %10 : vector<16x1xf32>
    %cst_5 = arith.constant 1.1920929E-7 : f32
    %12 = vector.broadcast %cst_5 : f32 to vector<16x1xf32>
    %13 = arith.maximumf %11, %12 : vector<16x1xf32>
    %14 = arith.divf %6, %13 : vector<16x1xf32>
    %15 = arith.divf %8, %13 : vector<16x1xf32>
    %cst_6 = arith.constant -1.280000e+02 : f32
    %16 = vector.broadcast %cst_6 : f32 to vector<16x1xf32>
    %17 = arith.addf %16, %14 : vector<16x1xf32>
    %cst_7 = arith.constant 1.270000e+02 : f32
    %18 = vector.broadcast %cst_7 : f32 to vector<16x1xf32>
    %19 = arith.addf %18, %15 : vector<16x1xf32>
    %20 = arith.addf %17, %19 : vector<16x1xf32>
    %cst_8 = arith.constant 0.000000e+00 : f32
    %21 = vector.broadcast %cst_8 : f32 to vector<16x1xf32>
    %22 = arith.cmpf ogt, %20, %21 : vector<16x1xf32>
    %cst_9 = arith.constant -1.280000e+02 : f32
    %23 = vector.broadcast %cst_9 : f32 to vector<16x1xf32>
    %24 = arith.subf %23, %14 : vector<16x1xf32>
    %cst_10 = arith.constant 1.270000e+02 : f32
    %25 = vector.broadcast %cst_10 : f32 to vector<16x1xf32>
    %26 = arith.subf %25, %15 : vector<16x1xf32>
    %27 = arith.select %22, %24, %26 : vector<16x1xi1>, vector<16x1xf32>
    %cst_11 = arith.constant -1.280000e+02 : f32
    %cst_12 = arith.constant 1.270000e+02 : f32
    %28 = vector.broadcast %cst_11 : f32 to vector<16x1xf32>
    %29 = arith.maximumf %28, %27 : vector<16x1xf32>
    %30 = vector.broadcast %cst_12 : f32 to vector<16x1xf32>
    %31 = arith.minimumf %30, %29 : vector<16x1xf32>
    %32 = math.roundeven %31 : vector<16x1xf32>
    %33 = vector.broadcast %13 : vector<16x1xf32> to vector<16x512xf32>
    %34 = arith.divf %0, %33 : vector<16x512xf32>
    %35 = vector.broadcast %32 : vector<16x1xf32> to vector<16x512xf32>
    %36 = arith.addf %34, %35 : vector<16x512xf32>
    %37 = math.roundeven %36 : vector<16x512xf32>
    %cst_13 = arith.constant -1.280000e+02 : f32
    %cst_14 = arith.constant 1.270000e+02 : f32
    %38 = vector.broadcast %cst_13 : f32 to vector<16x512xf32>
    %39 = arith.maximumf %38, %37 : vector<16x512xf32>
    %40 = vector.broadcast %cst_14 : f32 to vector<16x512xf32>
    %41 = arith.minimumf %40, %39 : vector<16x512xf32>
    %42 = vector.broadcast %32 : vector<16x1xf32> to vector<16x512xf32>
    %43 = arith.subf %41, %42 : vector<16x512xf32>
    %44 = arith.truncf %43 : vector<16x512xf32> to vector<16x512xbf16>
    %c0_15 = arith.constant 0 : index
    %c0_16 = arith.constant 0 : index
    %45 = vector.load %arg2[%c0_15, %c0_16] : memref<16x512xbf16, #tpu.memory_space<vmem>>, vector<16x512xbf16>
    tpu.vector_store %arg2[%c0_15, %c0_16], %44 {strides = array<i32>} : memref<16x512xbf16, #tpu.memory_space<vmem>>, vector<16x512xbf16>,
    %c0_17 = arith.constant 0 : index
    %c0_18 = arith.constant 0 : index
    %46 = vector.load %arg3[%c0_17, %c0_18] : memref<16x1xf32, #tpu.memory_space<vmem>>, vector<16x1xf32>
    tpu.vector_store %arg3[%c0_17, %c0_18], %13 {strides = array<i32>} : memref<16x1xf32, #tpu.memory_space<vmem>>, vector<16x1xf32>,
    %cst_19 = arith.constant dense<0.000000e+00> : vector<16xf32>
    %47 = vector.multi_reduction <add>, %43, %cst_19 [1] : vector<16x512xf32> to vector<16xf32>
    %48 = vector.shape_cast %47 : vector<16xf32> to vector<16x1xf32>
    %c0_20 = arith.constant 0 : index
    %c0_21 = arith.constant 0 : index
    %49 = vector.load %arg4[%c0_20, %c0_21] : memref<16x1xf32, #tpu.memory_space<vmem>>, vector<16x1xf32>
    tpu.vector_store %arg4[%c0_20, %c0_21], %48 {strides = array<i32>} : memref<16x1xf32, #tpu.memory_space<vmem>>, vector<16x1xf32>,
    return
  }
  func.func @transform_0(%arg0: i32) -> (i32, i32) {
    %c0_i32 = arith.constant 0 : i32
    %c0_i32_0 = arith.constant 0 : i32
    return %arg0, %c0_i32 : i32, i32
  }
  func.func @transform_1(%arg0: i32) -> (i32, i32) {
    %c0_i32 = arith.constant 0 : i32
    %c0_i32_0 = arith.constant 0 : i32
    return %arg0, %c0_i32 : i32, i32
  }
  func.func @transform_2(%arg0: i32) -> (i32, i32) {
    %c0_i32 = arith.constant 0 : i32
    %c0_i32_0 = arith.constant 0 : i32
    return %arg0, %c0_i32 : i32, i32
  }
  func.func @transform_3(%arg0: i32) -> (i32, i32) {
    %c0_i32 = arith.constant 0 : i32
    %c0_i32_0 = arith.constant 0 : i32
    return %arg0, %c0_i32 : i32, i32
  }
}

</mosaic_0001>

<bundles_post_ra>
// kernel: tpu_custom_call.1
= control target key start
LH: loop header
LB: loop body
LE: loop exit
PB: predicated region body
PF: predicated region fallthrough
CT: control target
= control target key end

     0   :  { %9 = vsyncpa [#allocation3], 0  ;;  %s493_s0 = inlined_call_operand.hbm [shape: f32[16,512], index: 0, kind: input, shape index: {}]   ;;  %s494_s1 = inlined_call_operand.hbm [shape: bf16[16,512], index: 1, kind: output, shape index: {0}]   ;;  %s495_s2 = inlined_call_operand.vmem [shape: f32[16,1], index: 2, kind: output, shape index: {1}]   ;;  %s496_s3 = inlined_call_operand.vmem [shape: f32[16,1], index: 3, kind: output, shape index: {2}]  }
   0x1   :  { %10 = vsyncpa [#allocation4], 0  ;;  %s349_s12 = smov [#allocation2]  }
   0x2   :  { %s16_s13 = sshll.u32 %s349_s12, 4  ;;  %s17_s13 = int_to_ptr.vmem [resolvable:$true] %s16_s13 }
   0x3   :  { %s313_s14 = scalar_lea.vmem %s17_s13, 1024  ;;  %p318_p1 = scmp.lt.s32.totalorder %s17_s13, %s17_s13 }
   0x4   :  { %p314_p0 = scmp.ne.s32.totalorder %s17_s13, %s313_s14  ;;  %p319_p2 = scmp.lt.s32.totalorder %s313_s14, %s313_s14 }
   0x6   :  { %p320_p3 = por %p319_p2, %p318_p1 }
   0x8   :  { %p321_p4 = pnand %p320_p3, %p314_p0 }
   0xa   :  { %324 = shalt.err (!%p321_p4)
}
   0xb   :  { %s350_s15 = smov 512   ;;  %s351_s16 = smov 32  }
   0xc   :  { %22 = dma.hbm_to_vmem [thread:$0]  %s493_s0, 1024, %s17_s13, [#allocation3], %s350_s15, %s350_s15, %s351_s16  }
   0xd   :  { %345 = dma.done.wait [#allocation3], 1024  }
   0xe   :  { %346 = vsyncadd [#allocation3], 4294966272  ;;  %v378_v0 = vld [vmem:[#allocation2] sm:$0xff]  ;;  %v380_v1 = vld [vmem:[#allocation2 + $0x8] sm:$0xff]  ;;  %vm167_vm0 = vcmask 7168  }
   0xf   :  { %v382_v2 = vld [vmem:[#allocation2 + $0x10] sm:$0xff]  ;;  %v384_v3 = vld [vmem:[#allocation2 + $0x18] sm:$0xff]  ;;  %v390_v6 = vld [vmem:[#allocation2 + $0x20] sm:$0xff] }
  0x10   :  { %v44_v4 = vmax.f32 %v378_v0, %v382_v2  ;;  %v34_v5 = vmin.f32 %v378_v0, %v382_v2  ;;  %v392_v7 = vld [vmem:[#allocation2 + $0x28] sm:$0xff]  ;;  %v45_v8 = vmax.f32 %v380_v1, %v384_v3  ;;  %v35_v9 = vmin.f32 %v380_v1, %v384_v3  ;;  %v398_v10 = vld [vmem:[#allocation2 + $0x30] sm:$0xff]  ;;  %v400_v11 = vld [vmem:[#allocation2 + $0x38] sm:$0xff] }
  0x11   :  { %v49_v12 = vmax.f32 %v390_v6, %v398_v10  ;;  %v50_v13 = vmax.f32 %v392_v7, %v400_v11  ;;  %v39_v14 = vmin.f32 %v390_v6, %v398_v10  ;;  %v40_v15 = vmin.f32 %v392_v7, %v400_v11 }
  0x12   :  { %v46_v16 = vmax.f32 %v44_v4, %v45_v8  ;;  %v36_v17 = vmin.f32 %v34_v5, %v35_v9 }
  0x13   :  { %v51_v18 = vmax.f32 %v49_v12, %v50_v13  ;;  %v41_v19 = vmin.f32 %v39_v14, %v40_v15 }
  0x14   :  { %47 = vmax.xlane.f32.xlu1 %v46_v16  ;;  %37 = vmin.xlane.f32.xlu0 %v36_v17 }
  0x18   :  { %52 = vmax.xlane.f32.xlu1 %v51_v18  ;;  %42 = vmin.xlane.f32.xlu0 %v41_v19 }
  0x9d   :  { %v48_v20 = vpop.xlane.xlu1 %47  ;;  %v38_v21 = vpop.xlane.xlu0 %37 }
  0x9e   :  { %v56_v22 = vmax.f32 %v48_v20, 0.0  ;;  %v54_v23 = vmin.f32 %v38_v21, 0.0 }
  0xa0   :  { %v58_v24 = vsub.f32 %v56_v22, %v54_v23 }
  0xa1   :  { %v53_v25 = vpop.xlane.xlu1 %52  ;;  %v43_v26 = vpop.xlane.xlu0 %42 }
  0xa2   :  { %v61_v27 = vmul.f32 0.003921569, %v58_v24  ;;  %v57_v28 = vmax.f32 %v53_v25, 0.0  ;;  %v55_v29 = vmin.f32 %v43_v26, 0.0 }
  0xa4   :  { %v63_v30 = vmax.f32 %v61_v27, 1.1920929e-07  ;;  %v59_v31 = vsub.f32 %v57_v28, %v55_v29 }
  0xa6   :  { %301 = vrcp.f32 %v63_v30  ;;  %v62_v32 = vmul.f32 0.003921569, %v59_v31  ;;  %168 = vst.msk [vmem:[%s495_s2] sm:$0xff] %vm167_vm0, %v63_v30 }
  0xa8   :  { %v64_v33 = vmax.f32 %v62_v32, 1.1920929e-07 }
  0xaa   :  { %303 = vrcp.f32 %v64_v33  ;;  %169 = vst.msk [vmem:[%s495_s2 + $0x8] sm:$0xff] %vm167_vm0, %v64_v33  ;;  %s352_s2 = smov [#allocation5]  }
  0xab   :  { %s187_s22 = sshll.u32 %s352_s2, 4  ;;  %s188_s22 = int_to_ptr.vmem [resolvable:$true] %s187_s22 }
  0xac   :  { %s325_s23 = scalar_lea.vmem %s188_s22, 512  ;;  %p330_p6 = scmp.lt.s32.totalorder %s188_s22, %s188_s22 }
  0xad   :  { %p326_p5 = scmp.ne.s32.totalorder %s188_s22, %s325_s23  ;;  %p331_p7 = scmp.lt.s32.totalorder %s325_s23, %s325_s23 }
  0xaf   :  { %p332_p8 = por %p331_p7, %p330_p6 }
  0xb1   :  { %p333_p9 = pnand %p332_p8, %p326_p5 }
  0xb3   :  { %v302_v34 = vpop.eup %301 }
  0xb4   :  { %v66_v35 = vmul.f32 %v302_v34, %v54_v23  ;;  %v69_v36 = vmul.f32 %v302_v34, %v56_v22  ;;  %v91_v4 = vmul.f32 %v302_v34, %v378_v0  ;;  %v92_v5 = vmul.f32 %v302_v34, %v380_v1 }
  0xb5   :  { %v93_v8 = vmul.f32 %v302_v34, %v382_v2  ;;  %v94_v9 = vmul.f32 %v302_v34, %v384_v3 }
  0xb6   :  { %v71_v37 = vadd.f32 -128.0, %v66_v35  ;;  %v73_v38 = vadd.f32 127.0, %v69_v36  ;;  %v79_v43 = vsub.f32 -128.0, %v66_v35  ;;  %v81_v44 = vsub.f32 127.0, %v69_v36 }
  0xb7   :  { %v304_v39 = vpop.eup %303 }
  0xb8   :  { %v75_v40 = vadd.f32 %v73_v38, %v71_v37  ;;  %v68_v41 = vmul.f32 %v304_v39, %v55_v29  ;;  %v70_v42 = vmul.f32 %v304_v39, %v57_v28  ;;  %v95_v1 = vmul.f32 %v304_v39, %v390_v6 }
  0xb9   :  { %v96_v2 = vmul.f32 %v304_v39, %v392_v7  ;;  %v97_v22 = vmul.f32 %v304_v39, %v398_v10  ;;  %v98_v25 = vmul.f32 %v304_v39, %v400_v11 }
  0xba   :  { %vm77_vm1 = vcmp.gt.f32.partialorder %v75_v40, 0.0  ;;  %v72_v45 = vadd.f32 -128.0, %v68_v41  ;;  %v74_v46 = vadd.f32 127.0, %v70_v42  ;;  %v80_v50 = vsub.f32 -128.0, %v68_v41 }
  0xbb   :  { %v83_v47 = vsel %vm77_vm1, %v79_v43, %v81_v44  ;;  %v82_v51 = vsub.f32 127.0, %v70_v42 }
  0xbc   :  { %v85_v48 = vmax.f32 %v83_v47, -128.0  ;;  %v76_v49 = vadd.f32 %v74_v46, %v72_v45 }
  0xbe   :  { %v87_v52 = vmin.f32 %v85_v48, 127.0  ;;  %vm78_vm2 = vcmp.gt.f32.partialorder %v76_v49, 0.0 }
  0xbf   :  { %v84_v53 = vsel %vm78_vm2, %v80_v50, %v82_v51 }
  0xc0   :  { %v217_v54 = vcvt.f32.s32 %v87_v52  ;;  %v86_v55 = vmax.f32 %v84_v53, -128.0  ;;  %v215_v58 = vand.u32 2147483647, %v87_v52  ;;  %v220_v60 = vand.u32 2147483648, %v87_v52 }
  0xc2   :  { %v218_v56 = vcvt.s32.f32 %v217_v54  ;;  %v88_v57 = vmin.f32 %v86_v55, 127.0  ;;  %vm216_vm3 = vcmp.lt.f32.partialorder %v215_v58, 8388608.0 }
  0xc4   :  { %v219_v59 = vand.u32 2147483647, %v218_v56  ;;  %v225_v61 = vcvt.f32.s32 %v88_v57  ;;  %v223_v13 = vand.u32 2147483647, %v88_v57  ;;  %v228_v15 = vand.u32 2147483648, %v88_v57 }
  0xc6   :  { %v221_v62 = vor.u32 %v220_v60, %v219_v59  ;;  %v226_v63 = vcvt.s32.f32 %v225_v61  ;;  %vm224_vm4 = vcmp.lt.f32.partialorder %v223_v13, 8388608.0 }
  0xc8   :  { %v422_v12 = vsel %vm216_vm3, %v221_v62, %v87_v52  ;;  %v227_v14 = vand.u32 2147483647, %v226_v63 }
  0xc9   :  { %v99_v16 = vadd.f32 %v422_v12, %v91_v4  ;;  %v100_v17 = vadd.f32 %v422_v12, %v92_v5  ;;  %v101_v18 = vadd.f32 %v422_v12, %v93_v8  ;;  %v102_v0 = vadd.f32 %v422_v12, %v94_v9 }
  0xca   :  { %v229_v19 = vor.u32 %v228_v15, %v227_v14 }
  0xcb   :  { %v231_v20 = vand.u32 2147483647, %v99_v16  ;;  %v233_v3 = vcvt.f32.s32 %v99_v16  ;;  %v239_v21 = vand.u32 2147483647, %v100_v17  ;;  %v241_v23 = vcvt.f32.s32 %v100_v17 }
  0xcc   :  { %v247_v24 = vand.u32 2147483647, %v101_v18  ;;  %v432_v26 = vsel %vm224_vm4, %v229_v19, %v88_v57  ;;  %v236_v28 = vand.u32 2147483648, %v99_v16  ;;  %v249_v29 = vcvt.f32.s32 %v101_v18 }
  0xcd   :  { %v234_v27 = vcvt.s32.f32 %v233_v3  ;;  %vm434_vm5 = vcmp.lt.f32.partialorder %v231_v20, 8388608.0  ;;  %v242_v6 = vcvt.s32.f32 %v241_v23  ;;  %v244_v7 = vand.u32 2147483648, %v100_v17 }
  0xce   :  { %v255_v31 = vand.u32 2147483647, %v102_v0  ;;  %vm438_vm6 = vcmp.lt.f32.partialorder %v239_v21, 8388608.0  ;;  %v250_v33 = vcvt.s32.f32 %v249_v29  ;;  %v257_v34 = vcvt.f32.s32 %v102_v0 }
  0xcf   :  { %v235_v32 = vand.u32 2147483647, %v234_v27  ;;  %v243_v11 = vand.u32 2147483647, %v242_v6  ;;  %vm442_vm7 = vcmp.lt.f32.partialorder %v247_v24, 8388608.0  ;;  %v252_v36 = vand.u32 2147483648, %v101_v18 }
  0xd0   :  { %v103_v37 = vadd.f32 %v432_v26, %v95_v1  ;;  %v251_v39 = vand.u32 2147483647, %v250_v33  ;;  %v258_v40 = vcvt.s32.f32 %v257_v34  ;;  %v260_v41 = vand.u32 2147483648, %v102_v0 }
  0xd1   :  { %v237_v38 = vor.u32 %v236_v28, %v235_v32  ;;  %v245_v42 = vor.u32 %v244_v7, %v243_v11  ;;  %vm447_vm8 = vcmp.lt.f32.partialorder %v255_v31, 8388608.0  ;;  %v104_v44 = vadd.f32 %v432_v26, %v96_v2 }
  0xd2   :  { %v265_v45 = vcvt.f32.s32 %v103_v37  ;;  %v253_v47 = vor.u32 %v252_v36, %v251_v39  ;;  %v259_v48 = vand.u32 2147483647, %v258_v40  ;;  %v105_v49 = vadd.f32 %v432_v26, %v97_v22 }
  0xd3   :  { %v238_v46 = vsel %vm434_vm5, %v237_v38, %v99_v16  ;;  %v246_v50 = vsel %vm438_vm6, %v245_v42, %v100_v17  ;;  %v263_v52 = vand.u32 2147483647, %v103_v37  ;;  %v268_v57 = vand.u32 2147483648, %v103_v37 }
  0xd4   :  { %v115_v51 = vmax.f32 %v238_v46, -128.0  ;;  %v266_v53 = vcvt.s32.f32 %v265_v45  ;;  %v254_v54 = vsel %vm442_vm7, %v253_v47, %v101_v18  ;;  %v261_v55 = vor.u32 %v260_v41, %v259_v48 }
  0xd5   :  { %v116_v56 = vmax.f32 %v246_v50, -128.0  ;;  %v117_v58 = vmax.f32 %v254_v54, -128.0  ;;  %v273_v61 = vcvt.f32.s32 %v104_v44  ;;  %v106_v4 = vadd.f32 %v432_v26, %v98_v25 }
  0xd6   :  { %v123_v59 = vmin.f32 %v115_v51, 127.0  ;;  %v267_v60 = vand.u32 2147483647, %v266_v53  ;;  %v262_v62 = vsel %vm447_vm8, %v261_v55, %v102_v0  ;;  %v271_v5 = vand.u32 2147483647, %v104_v44 }
  0xd7   :  { %v124_v63 = vmin.f32 %v116_v56, 127.0  ;;  %v118_v8 = vmax.f32 %v262_v62, -128.0  ;;  %v125_v9 = vmin.f32 %v117_v58, 127.0  ;;  %vm464_vm9 = vcmp.lt.f32.partialorder %v263_v52, 8388608.0 }
  0xd8   :  { %v131_v13 = vsub.f32 %v123_v59, %v422_v12  ;;  %v269_v14 = vor.u32 %v268_v57, %v267_v60  ;;  %v274_v17 = vcvt.s32.f32 %v273_v61  ;;  %v281_v18 = vcvt.f32.s32 %v105_v49 }
  0xd9   :  { %v132_v15 = vsub.f32 %v124_v63, %v422_v12  ;;  %v126_v19 = vmin.f32 %v118_v8, 127.0  ;;  %v133_v0 = vsub.f32 %v125_v9, %v422_v12  ;;  %v276_v21 = vand.u32 2147483648, %v104_v44 }
  0xda   :  { %v270_v1 = vsel %vm464_vm9, %v269_v14, %v103_v37  ;;  %v275_v3 = vand.u32 2147483647, %v274_v17  ;;  %vm472_vm10 = vcmp.lt.f32.partialorder %v271_v5, 8388608.0  ;;  %v282_v24 = vcvt.s32.f32 %v281_v18 }
  0xdb   :  { %v170_v2 = vadd.f32 %v132_v15, %v131_v13  ;;  %v211_v20 = vpack.c.bf16 %v132_v15, %v131_v13  ;;  %v134_v22 = vsub.f32 %v126_v19, %v422_v12  ;;  %v289_v25 = vcvt.f32.s32 %v106_v4 }
  0xdc   :  { %v277_v28 = vor.u32 %v276_v21, %v275_v3  ;;  %v279_v29 = vand.u32 2147483647, %v105_v49  ;;  %v119_v30 = vmax.f32 %v270_v1, -128.0  ;;  %v283_v7 = vand.u32 2147483647, %v282_v24 }
  0xdd   :  { %v171_v27 = vadd.f32 %v170_v2, %v133_v0  ;;  %163 = vst [vmem:[#allocation5] sm:$0xff] %v211_v20  ;;  %v212_v6 = vpack.c.bf16 %v134_v22, %v133_v0  ;;  %v284_v31 = vand.u32 2147483648, %v105_v49  ;;  %v290_v32 = vcvt.s32.f32 %v289_v25 }
  0xde   :  { %v278_v33 = vsel %vm472_vm10, %v277_v28, %v104_v44  ;;  %v287_v12 = vand.u32 2147483647, %v106_v4  ;;  %v127_v34 = vmin.f32 %v119_v30, 127.0  ;;  %v292_v36 = vand.u32 2147483648, %v106_v4 }
  0xdf   :  { %v172_v10 = vadd.f32 %v171_v27, %v134_v22  ;;  %164 = vst [vmem:[#allocation5 + $0x8] sm:$0xff] %v212_v6  ;;  %v285_v11 = vor.u32 %v284_v31, %v283_v7  ;;  %v291_v35 = vand.u32 2147483647, %v290_v32  ;;  %v120_v37 = vmax.f32 %v278_v33, -128.0 }
  0xe0   :  { %vm280_vm11 = vcmp.lt.f32.partialorder %v279_v29, 8388608.0  ;;  %v135_v41 = vsub.f32 %v127_v34, %v432_v26  ;;  %vm288_vm12 = vcmp.lt.f32.partialorder %v287_v12, 8388608.0 }
  0xe1   :  { %173 = vadd.xlane.f32.xlu0 %v172_v10  ;;  %v286_v38 = vsel %vm280_vm11, %v285_v11, %v105_v49  ;;  %v293_v39 = vor.u32 %v292_v36, %v291_v35  ;;  %v128_v40 = vmin.f32 %v120_v37, 127.0 }
  0xe2   :  { %v121_v42 = vmax.f32 %v286_v38, -128.0 }
  0xe3   :  { %v294_v43 = vsel %vm288_vm12, %v293_v39, %v106_v4  ;;  %v136_v45 = vsub.f32 %v128_v40, %v432_v26 }
  0xe4   :  { %v122_v44 = vmax.f32 %v294_v43, -128.0  ;;  %v129_v46 = vmin.f32 %v121_v42, 127.0 }
  0xe5   :  { %v175_v47 = vadd.f32 %v136_v45, %v135_v41  ;;  %v213_v48 = vpack.c.bf16 %v136_v45, %v135_v41 }
  0xe6   :  { %v130_v50 = vmin.f32 %v122_v44, 127.0  ;;  %v137_v51 = vsub.f32 %v129_v46, %v432_v26 }
  0xe7   :  { %165 = vst [vmem:[#allocation5 + $0x10] sm:$0xff] %v213_v48 }
  0xe8   :  { %v138_v52 = vsub.f32 %v130_v50, %v432_v26  ;;  %v176_v49 = vadd.f32 %v175_v47, %v137_v51 }
  0xea   :  { %v214_v53 = vpack.c.bf16 %v138_v52, %v137_v51  ;;  %v177_v54 = vadd.f32 %v176_v49, %v138_v52 }
  0xec   :  { %166 = vst [vmem:[#allocation5 + $0x18] sm:$0xff] %v214_v53  ;;  %178 = vadd.xlane.f32.xlu1 %v177_v54 }
  0xed   :  { %336 = shalt.err (!%p333_p9)
}
  0xee   :  { %s353_s24 = smov 256   ;;  %s354_s25 = smov 16  }
  0xef   :  { %193 = dma.vmem_to_hbm [thread:$0]  %s188_s22, 512, %s494_s1, [#allocation4], %s353_s24, %s353_s24, %s354_s25  }
 0x16a   :  { %v174_v26 = vpop.xlane.xlu0 %173 }
 0x16b   :  { %180 = vst.msk [vmem:[%s496_s3] sm:$0xff] %vm167_vm0, %v174_v26 }
 0x175   :  { %v179_v55 = vpop.xlane.xlu1 %178 }
 0x176   :  { %181 = vst.msk [vmem:[%s496_s3 + $0x8] sm:$0xff] %vm167_vm0, %v179_v55 }
 0x177   :  { %347 = dma.done.wait [#allocation4], 512  }
 0x178   :  { %348 = vsyncadd [#allocation4], 4294966784 }
 0x179   :  { %205 = vsyncpa [#allocation3], 1 }
 0x17a   :  { %206 = vsyncpa [#allocation4], 1 }

</bundles_post_ra>
